<compile_context>
chip_gen: v5e
topology: v5e:2x2
jax: 0.10.0
libtpu: 0.0.40
codegen_flags: <defaults>
</compile_context>

<pallas_src>
import functools

import jax
import jax.numpy as jnp
from jax import lax
from jax.experimental import pallas as pl
from jax.experimental.pallas import tpu as pltpu

EPS = 1e-12


def _self_output_kernel(x_ref, res_ref, w_ref, b_ref, g_ref, beta_ref, o_ref):
    # Dense: x @ W (W already transposed to (in, out) by the wrapper).
    x = x_ref[...].astype(w_ref.dtype)                       # bf16 operands
    h = jnp.dot(x, w_ref[...], preferred_element_type=jnp.float32)  # f32 acc
    h = h + b_ref[...]                                       # bias (f32)
    # TODO(synk): dropout omitted (module in eval mode -> identity)
    h = h + res_ref[...].astype(jnp.float32)                 # residual add (f32)
    # BertLayerNorm: biased variance, eps inside rsqrt, affine in f32
    mean = jnp.mean(h, axis=-1, keepdims=True)
    centered = h - mean
    var = jnp.mean(centered * centered, axis=-1, keepdims=True)
    normed = centered * lax.rsqrt(var + EPS)
    o_ref[...] = (normed * g_ref[...] + beta_ref[...]).astype(o_ref.dtype)


@functools.lru_cache(maxsize=None)
def _vmem_capacity():
    """Per-core VMEM capacity in bytes (HW-queried; conservative fallback)."""
    try:
        info = pltpu.get_tpu_info()
        cap = getattr(info, "vmem_capacity_bytes", None)
        if cap:
            return int(cap)
    except Exception:
        pass
    return 64 << 20  # v7x per-TC capacity; safe lower bound everywhere


def _vmem_accounting(hidden, itemsize, mm_itemsize, block_rows):
    """Consistent per-step VMEM estimate (residents + 2x-buffered streams + temps)."""
    resident = hidden * hidden * mm_itemsize + 3 * 8 * hidden * 4   # W + b/g/beta
    # 3 streams (x, res, out) double-buffered + f32 temps (h/centered/normed)
    # + the in-kernel bf16 copy of x.
    per_row = hidden * (2 * 3 * itemsize + 3 * 4 + mm_itemsize)
    return resident, per_row, resident + per_row * block_rows


def _choose_block_rows(rows, hidden, itemsize, mm_itemsize, requested, vmem_cap):
    # Sublane packing: f32 -> 8 rows/tile, bf16 -> 16, int8/fp8 -> 32.
    sublane = {4: 8, 2: 16, 1: 32}.get(itemsize, 8)
    resident, per_row, _ = _vmem_accounting(hidden, itemsize, mm_itemsize, 0)
    budget = max(int(0.75 * vmem_cap) - resident, sublane * per_row)
    max_br = max(sublane, (budget // per_row) // sublane * sublane)
    br = min(requested, max_br)
    if br >= rows:
        return int(rows)                      # one full-array block (always legal)
    return int(max(sublane, (br // sublane) * sublane))


@functools.partial(jax.jit, static_argnames=("block_rows", "matmul_in_bf16"))
def bert_self_output(hidden_states, input_tensor, weight, bias, gamma, beta,
                     block_rows=1024, matmul_in_bf16=True):
    """hidden_states, input_tensor: [B, S, H]; weight: [H, H] (PyTorch (out,in));
    bias / gamma / beta: [H].  Output dtype == hidden_states dtype."""
    B, S, H = hidden_states.shape
    rows = B * S
    in_dtype = hidden_states.dtype
    itemsize = jnp.dtype(in_dtype).itemsize
    mm_dtype = jnp.bfloat16 if matmul_in_bf16 else in_dtype
    mm_itemsize = jnp.dtype(mm_dtype).itemsize

    vmem_cap = _vmem_capacity()
    block_rows = _choose_block_rows(rows, H, itemsize, mm_itemsize,
                                    block_rows, vmem_cap)

    x2 = hidden_states.reshape(rows, H)
    r2 = input_tensor.reshape(rows, H)

    # One-time param prep: transpose (out,in) -> (in,out) for a canonical
    # [M,K]x[K,N] MXU feed; cast small params to their kernel dtypes.
    w = weight.T.astype(mm_dtype)
    b2 = bias.astype(jnp.float32).reshape(1, H)
    g2 = gamma.astype(jnp.float32).reshape(1, H)
    be2 = beta.astype(jnp.float32).reshape(1, H)

    # Ragged B*S: cdiv grid; the partial last block is masked on writeback
    # (rows are independent), so no padded HBM copies and no output slice.
    grid = (pl.cdiv(rows, block_rows),)
    row_spec = pl.BlockSpec((block_rows, H), lambda i: (i, 0))
    # Whole-array VMEM residents: loaded once, single-buffered.
    vmem_spec = pl.BlockSpec(memory_space=pltpu.MemorySpace.VMEM)
    # Note: if a trace ever shows exposed input DMA, bump x/res specs to
    # pipeline_mode=pl.Buffered(3); default depth 2 is enough at these tile sizes.

    _, _, est = _vmem_accounting(H, itemsize, mm_itemsize, block_rows)
    vmem_limit = int(min(max(est + (8 << 20), 32 << 20), vmem_cap - (4 << 20)))

    out = pl.pallas_call(
        _self_output_kernel,
        out_shape=jax.ShapeDtypeStruct((rows, H), in_dtype),
        grid=grid,
        in_specs=[row_spec, row_spec, vmem_spec, vmem_spec, vmem_spec, vmem_spec],
        out_specs=row_spec,
        compiler_params=pltpu.CompilerParams(
            dimension_semantics=("parallel",),   # row tiles independent -> megacore/2-TC shardable
            vmem_limit_bytes=vmem_limit),
    )(x2, r2, w, b2, g2, be2)

    return out.reshape(B, S, H)


def _reference(hidden_states, input_tensor, weight, bias, gamma, beta):
    h = jnp.einsum("bsh,oh->bso", hidden_states, weight) + bias
    h = h + input_tensor
    u = h.mean(-1, keepdims=True)
    s = ((h - u) ** 2).mean(-1, keepdims=True)
    h = (h - u) / jnp.sqrt(s + EPS)
    return gamma * h + beta


if __name__ == "__main__":
    B, S, H = 2, 8, 32
    key = jax.random.PRNGKey(0)
    k1, k2, k3, k4 = jax.random.split(key, 4)

    hidden_states = jax.random.normal(k1, (B, S, H), dtype=jnp.float32)
    input_tensor = jax.random.normal(k2, (B, S, H), dtype=jnp.float32)
    # deterministic "Linear" params, (out_features, in_features) like nn.Linear
    weight = jax.random.normal(k3, (H, H), dtype=jnp.float32) * (1.0 / H ** 0.5)
    bias = jax.random.normal(k4, (H,), dtype=jnp.float32) * 0.1
    gamma = jnp.ones((H,), dtype=jnp.float32)
    beta = jnp.zeros((H,), dtype=jnp.float32)

    out = bert_self_output(hidden_states, input_tensor, weight, bias, gamma, beta)
    out = jax.block_until_ready(out)

    ref = _reference(hidden_states, input_tensor, weight, bias, gamma, beta)
    assert out.shape == (B, S, H)
    # bf16 matmul operands (f32 accumulate) -> tolerance loosened accordingly
    assert jnp.allclose(out, ref, atol=2e-2, rtol=2e-2), "mismatch vs reference"
    print("KERNEL_OK")
</pallas_src>

<mosaic_0001>
module attributes {stable_mosaic.version = 11 : i64} {
  func.func @_self_output_kernel(%arg0: i32, %arg1: memref<16x32xf32, #tpu.memory_space<vmem>>, %arg2: memref<16x32xf32, #tpu.memory_space<vmem>>, %arg3: memref<32x32xbf16, #tpu.memory_space<vmem>>, %arg4: memref<1x32xf32, #tpu.memory_space<vmem>>, %arg5: memref<1x32xf32, #tpu.memory_space<vmem>>, %arg6: memref<1x32xf32, #tpu.memory_space<vmem>>, %arg7: memref<16x32xf32, #tpu.memory_space<vmem>>) attributes {dimension_semantics = [#tpu.dimension_semantics<parallel>], iteration_bounds = array<i64: 1>, scalar_prefetch = 0 : i64, scratch_operands = 0 : i64, tpu.core_type = #tpu.core_type<tc>, window_params = [{transform_indices = @transform_0, window_bounds = array<i64: 16, 32>}, {transform_indices = @transform_1, window_bounds = array<i64: 16, 32>}, {pipeline_mode = #tpu.pipeline_mode<synchronous>, transform_indices = @transform_2, window_bounds = array<i64: 32, 32>}, {pipeline_mode = #tpu.pipeline_mode<synchronous>, transform_indices = @transform_3, window_bounds = array<i64: 1, 32>}, {pipeline_mode = #tpu.pipeline_mode<synchronous>, transform_indices = @transform_4, window_bounds = array<i64: 1, 32>}, {pipeline_mode = #tpu.pipeline_mode<synchronous>, transform_indices = @transform_5, window_bounds = array<i64: 1, 32>}, {transform_indices = @transform_6, window_bounds = array<i64: 16, 32>}]} {
    %c0 = arith.constant 0 : index
    %c0_0 = arith.constant 0 : index
    %0 = vector.load %arg1[%c0, %c0_0] : memref<16x32xf32, #tpu.memory_space<vmem>>, vector<16x32xf32>
    %1 = arith.truncf %0 : vector<16x32xf32> to vector<16x32xbf16>
    %c0_1 = arith.constant 0 : index
    %c0_2 = arith.constant 0 : index
    %2 = vector.load %arg3[%c0_1, %c0_2] : memref<32x32xbf16, #tpu.memory_space<vmem>>, vector<32x32xbf16>
    %cst = arith.constant dense<0.000000e+00> : vector<16x32xf32>
    %3 = tpu.matmul %1, %2, %cst {dimension_numbers = #tpu.dot_dimension_numbers<[1], [0], [0], [1], [0, 0, 1, 1], [], []>} : vector<16x32xbf16>, vector<32x32xbf16>, vector<16x32xf32> -> vector<16x32xf32>
    %c0_3 = arith.constant 0 : index
    %c0_4 = arith.constant 0 : index
    %4 = vector.load %arg4[%c0_3, %c0_4] : memref<1x32xf32, #tpu.memory_space<vmem>>, vector<1x32xf32>
    %5 = vector.broadcast %4 : vector<1x32xf32> to vector<16x32xf32>
    %6 = arith.addf %3, %5 : vector<16x32xf32>
    %c0_5 = arith.constant 0 : index
    %c0_6 = arith.constant 0 : index
    %7 = vector.load %arg2[%c0_5, %c0_6] : memref<16x32xf32, #tpu.memory_space<vmem>>, vector<16x32xf32>
    %8 = arith.addf %6, %7 : vector<16x32xf32>
    %cst_7 = arith.constant dense<0.000000e+00> : vector<16xf32>
    %9 = vector.multi_reduction <add>, %8, %cst_7 [1] : vector<16x32xf32> to vector<16xf32>
    %10 = vector.shape_cast %9 : vector<16xf32> to vector<16x1xf32>
    %cst_8 = arith.constant 3.200000e+01 : f32
    %11 = vector.broadcast %cst_8 : f32 to vector<16x1xf32>
    %12 = arith.divf %10, %11 : vector<16x1xf32>
    %13 = vector.broadcast %12 : vector<16x1xf32> to vector<16x32xf32>
    %14 = arith.subf %8, %13 : vector<16x32xf32>
    %15 = arith.mulf %14, %14 : vector<16x32xf32>
    %cst_9 = arith.constant dense<0.000000e+00> : vector<16xf32>
    %16 = vector.multi_reduction <add>, %15, %cst_9 [1] : vector<16x32xf32> to vector<16xf32>
    %17 = vector.shape_cast %16 : vector<16xf32> to vector<16x1xf32>
    %cst_10 = arith.constant 3.200000e+01 : f32
    %18 = vector.broadcast %cst_10 : f32 to vector<16x1xf32>
    %19 = arith.divf %17, %18 : vector<16x1xf32>
    %cst_11 = arith.constant 9.99999996E-13 : f32
    %20 = vector.broadcast %cst_11 : f32 to vector<16x1xf32>
    %21 = arith.addf %19, %20 : vector<16x1xf32>
    %22 = math.rsqrt %21 : vector<16x1xf32>
    %23 = vector.broadcast %22 : vector<16x1xf32> to vector<16x32xf32>
    %24 = arith.mulf %14, %23 : vector<16x32xf32>
    %c0_12 = arith.constant 0 : index
    %c0_13 = arith.constant 0 : index
    %25 = vector.load %arg5[%c0_12, %c0_13] : memref<1x32xf32, #tpu.memory_space<vmem>>, vector<1x32xf32>
    %26 = vector.broadcast %25 : vector<1x32xf32> to vector<16x32xf32>
    %27 = arith.mulf %24, %26 : vector<16x32xf32>
    %c0_14 = arith.constant 0 : index
    %c0_15 = arith.constant 0 : index
    %28 = vector.load %arg6[%c0_14, %c0_15] : memref<1x32xf32, #tpu.memory_space<vmem>>, vector<1x32xf32>
    %29 = vector.broadcast %28 : vector<1x32xf32> to vector<16x32xf32>
    %30 = arith.addf %27, %29 : vector<16x32xf32>
    %c0_16 = arith.constant 0 : index
    %c0_17 = arith.constant 0 : index
    %31 = vector.load %arg7[%c0_16, %c0_17] : memref<16x32xf32, #tpu.memory_space<vmem>>, vector<16x32xf32>
    tpu.vector_store %arg7[%c0_16, %c0_17], %30 {strides = array<i32>} : memref<16x32xf32, #tpu.memory_space<vmem>>, vector<16x32xf32>,
    return
  }
  func.func @transform_0(%arg0: i32) -> (i32, i32) {
    %c0_i32 = arith.constant 0 : i32
    %c0_i32_0 = arith.constant 0 : i32
    return %arg0, %c0_i32 : i32, i32
  }
  func.func @transform_1(%arg0: i32) -> (i32, i32) {
    %c0_i32 = arith.constant 0 : i32
    %c0_i32_0 = arith.constant 0 : i32
    return %arg0, %c0_i32 : i32, i32
  }
  func.func @transform_2(%arg0: i32) -> (i32, i32) {
    %c0_i32 = arith.constant 0 : i32
    %c0_i32_0 = arith.constant 0 : i32
    %c0_i32_1 = arith.constant 0 : i32
    return %c0_i32, %c0_i32_0 : i32, i32
  }
  func.func @transform_3(%arg0: i32) -> (i32, i32) {
    %c0_i32 = arith.constant 0 : i32
    %c0_i32_0 = arith.constant 0 : i32
    %c0_i32_1 = arith.constant 0 : i32
    return %c0_i32, %c0_i32_0 : i32, i32
  }
  func.func @transform_4(%arg0: i32) -> (i32, i32) {
    %c0_i32 = arith.constant 0 : i32
    %c0_i32_0 = arith.constant 0 : i32
    %c0_i32_1 = arith.constant 0 : i32
    return %c0_i32, %c0_i32_0 : i32, i32
  }
  func.func @transform_5(%arg0: i32) -> (i32, i32) {
    %c0_i32 = arith.constant 0 : i32
    %c0_i32_0 = arith.constant 0 : i32
    %c0_i32_1 = arith.constant 0 : i32
    return %c0_i32, %c0_i32_0 : i32, i32
  }
  func.func @transform_6(%arg0: i32) -> (i32, i32) {
    %c0_i32 = arith.constant 0 : i32
    %c0_i32_0 = arith.constant 0 : i32
    return %arg0, %c0_i32 : i32, i32
  }
}

</mosaic_0001>

<bundles_post_ra>
// kernel: bert_self_output.1
= control target key start
LH: loop header
LB: loop body
LE: loop exit
PB: predicated region body
PF: predicated region fallthrough
CT: control target
= control target key end

     0   :  { %s279_s0 = inlined_call_operand.vmem [shape: f32[16,32], index: 0, kind: input, shape index: {}]   ;;  %s280_s1 = inlined_call_operand.vmem [shape: f32[16,32], index: 1, kind: input, shape index: {}]   ;;  %s281_s2 = inlined_call_operand.vmem [shape: bf16[32,32], index: 2, kind: input, shape index: {}]   ;;  %s282_s3 = inlined_call_operand.vmem [shape: f32[1,32], index: 3, kind: input, shape index: {}]   ;;  %s283_s4 = inlined_call_operand.vmem [shape: f32[1,32], index: 4, kind: input, shape index: {}]   ;;  %s284_s5 = inlined_call_operand.vmem [shape: f32[1,32], index: 5, kind: input, shape index: {}]   ;;  %s285_s6 = inlined_call_operand.hbm [shape: f32[16,32], index: 6, kind: output, shape index: {}]  }
   0x1   :  { %v163_v0 = vld [vmem:[%s281_s2 + $0x8] sm:$0xff]  ;;  %v162_v1 = vld [vmem:[%s281_s2] sm:$0xff] }
   0x2   :  { %v25_v2 = vld [vmem:[%s279_s0] sm:$0xff]  ;;  %v26_v3 = vld [vmem:[%s279_s0 + $0x8] sm:$0xff]  ;;  %58 = vmatpush.bf16.msra.mxu0 %v163_v0 }
   0x3   :  { %11 = vsyncpa [#allocation3], 0  ;;  %v27_v4 = vpack.c.bf16 %v26_v3, %v25_v2  ;;  %vm48_vm0 = vcmask 261120   ;;  %v168_v5 = vld [vmem:[%s282_s3] ss:$0 sm:$0xff]  ;;  %v67_v12 = vld [vmem:[%s280_s1 + $0x8] sm:$0xff] }
   0x4   :  { %v66_v7 = vld [vmem:[%s280_s1] sm:$0xff]  ;;  %v203_v16 = vmov 32.0   ;;  %s141_s14 = sshll.u32 %s285_s6, 4  ;;  %s206_s15 = smov 8   ;;  %s142_s14 = int_to_ptr.hbm [resolvable:$true] %s141_s14 }
   0x5   :  { %171 = vrcp.f32 %v203_v16  ;;  %v169_v47 = vld [vmem:[%s283_s4] ss:$0 sm:$0xff]  ;;  %s204_s4 = smov [#allocation2]  }
   0x6   :  { %59 = vmatpush.bf16.msra.mxu0 %v162_v1  ;;  %v170_v51 = vld [vmem:[%s284_s5] ss:$0 sm:$0xff]  ;;  %s139_s11 = sshll.u32 %s204_s4, 4  ;;  %s205_s5 = smov 128   ;;  %s140_s11 = int_to_ptr.vmem [resolvable:$true] %s139_s11 }
   0x9   :  { %161 = vmatmul.msk.bf16.vlgmr.msra.gmra.mxu0 %vm48_vm0, %v27_v4 }
   0xb   :  { %v172_v17 = vpop.eup %171 }
   0xc   :  { %v77_v18 = vmul.f32 32.0, %v172_v17  ;;  %vm81_vm1 = vweird.f32 %v172_v17 }
   0xe   :  { %v78_v19 = vsub.f32 1.0, %v77_v18 }
  0x10   :  { %v79_v20 = vmul.f32 %v172_v17, %v78_v19 }
  0x12   :  { %v80_v21 = vadd.f32 %v172_v17, %v79_v20 }
  0x14   :  { %v82_v22 = vsel %vm81_vm1, %v172_v17, %v80_v21 }
  0x86   :  { %v61_v6 = vpop.f32.mrf.mxu0 }
  0x87   :  { %v62_v8 = vadd.f32 %v168_v5, %v61_v6 }
  0x89   :  { %v68_v9 = vadd.f32 %v66_v7, %v62_v8 }
  0x8b   :  { %v70_v10 = vsel %vm48_vm0, %v68_v9, 0.0 }
  0x8c   :  { %71 = vadd.xlane.f32.xlu0 %v70_v10 }
  0x8e   :  { %v63_v11 = vpop.f32.mrf.mxu0 }
  0x8f   :  { %v64_v13 = vadd.f32 %v168_v5, %v63_v11 }
  0x91   :  { %v69_v14 = vadd.f32 %v67_v12, %v64_v13 }
  0x93   :  { %v73_v15 = vsel %vm48_vm0, %v69_v14, 0.0 }
  0x94   :  { %74 = vadd.xlane.f32.xlu0 %v73_v15 }
  0xff   :  { %v72_v23 = vpop.xlane.xlu0 %71 }
 0x100   :  { %v83_v24 = vmul.f32 %v82_v22, %v72_v23 }
 0x102   :  { %v85_v25 = vsub.f32 %v68_v9, %v83_v24 }
 0x104   :  { %v87_v26 = vmul.f32 %v85_v25, %v85_v25 }
 0x106   :  { %v89_v27 = vsel %vm48_vm0, %v87_v26, 0.0 }
 0x107   :  { %90 = vadd.xlane.f32.xlu1 %v89_v27  ;;  %v75_v28 = vpop.xlane.xlu0 %74 }
 0x108   :  { %v84_v29 = vmul.f32 %v82_v22, %v75_v28 }
 0x10a   :  { %v86_v30 = vsub.f32 %v69_v14, %v84_v29 }
 0x10c   :  { %v88_v31 = vmul.f32 %v86_v30, %v86_v30 }
 0x10e   :  { %v92_v32 = vsel %vm48_vm0, %v88_v31, 0.0 }
 0x10f   :  { %93 = vadd.xlane.f32.xlu1 %v92_v32 }
 0x17a   :  { %v91_v33 = vpop.xlane.xlu1 %90 }
 0x17b   :  { %v95_v34 = vmul.f32 %v91_v33, %v82_v22 }
 0x17d   :  { %v97_v35 = vadd.f32 1e-12, %v95_v34 }
 0x17f   :  { %173 = vrsqrt.f32 %v97_v35  ;;  %vm105_vm3 = vweird.f32 %v97_v35 }
 0x182   :  { %v94_v36 = vpop.xlane.xlu1 %93 }
 0x183   :  { %v96_v37 = vmul.f32 %v94_v36, %v82_v22 }
 0x185   :  { %v174_v38 = vpop.eup %173  ;;  %v98_v39 = vadd.f32 1e-12, %v96_v37 }
 0x186   :  { %v100_v40 = vmul.f32 %v174_v38, %v97_v35  ;;  %vm106_vm2 = vweird.f32 %v174_v38 }
 0x187   :  { %175 = vrsqrt.f32 %v98_v39  ;;  %vm107_vm4 = vmor %vm105_vm3, %vm106_vm2  ;;  %vm115_vm6 = vweird.f32 %v98_v39 }
 0x188   :  { %v101_v41 = vmul.f32 %v174_v38, %v100_v40 }
 0x18a   :  { %v102_v42 = vmul.f32 0.5, %v101_v41 }
 0x18c   :  { %v103_v43 = vsub.f32 1.5, %v102_v42 }
 0x18d   :  { %v176_v44 = vpop.eup %175 }
 0x18e   :  { %v104_v45 = vmul.f32 %v174_v38, %v103_v43  ;;  %v110_v46 = vmul.f32 %v176_v44, %v98_v39  ;;  %vm116_vm5 = vweird.f32 %v176_v44 }
 0x18f   :  { %vm117_vm7 = vmor %vm115_vm6, %vm116_vm5 }
 0x190   :  { %v108_v48 = vsel %vm107_vm4, %v174_v38, %v104_v45  ;;  %v111_v49 = vmul.f32 %v176_v44, %v110_v46 }
 0x191   :  { %v119_v50 = vmul.f32 %v108_v48, %v85_v25 }
 0x192   :  { %v112_v52 = vmul.f32 0.5, %v111_v49 }
 0x193   :  { %v125_v53 = vmul.f32 %v169_v47, %v119_v50 }
 0x194   :  { %v113_v54 = vsub.f32 1.5, %v112_v52 }
 0x195   :  { %v131_v55 = vadd.f32 %v170_v51, %v125_v53 }
 0x196   :  { %v114_v56 = vmul.f32 %v176_v44, %v113_v54 }
 0x197   :  { %133 = vst.msk [vmem:[#allocation2] sm:$0xff] %vm48_vm0, %v131_v55 }
 0x198   :  { %v118_v57 = vsel %vm117_vm7, %v176_v44, %v114_v56 }
 0x199   :  { %v120_v58 = vmul.f32 %v118_v57, %v86_v30 }
 0x19b   :  { %v126_v59 = vmul.f32 %v169_v47, %v120_v58 }
 0x19d   :  { %v132_v60 = vadd.f32 %v170_v51, %v126_v59 }
 0x19f   :  { %134 = vst.msk [vmem:[#allocation2 + $0x8] sm:$0xff] %vm48_vm0, %v132_v60 }
 0x1a0   :  { %147 = dma.vmem_to_hbm [thread:$0]  %s140_s11, 256, %s142_s14, [#allocation3], %s205_s5, %s205_s5, %s206_s15  }
 0x1a1   :  { %201 = dma.done.wait [#allocation3], 256  }
 0x1a2   :  { %202 = vsyncadd [#allocation3], 4294967040 }
 0x1a3   :  { %152 = vsyncpa [#allocation3], 1 }

</bundles_post_ra>
